<compile_context>
chip_gen: v7x
topology: tpu7x:2x2x1
jax: 0.10.0
libtpu: 0.0.40
codegen_flags: <defaults>
</compile_context>

<pallas_src>
import jax
import jax.numpy as jnp
from jax import lax
from jax.experimental import pallas as pl
from jax.experimental.pallas import tpu as pltpu


def lstm_tagger_kernel(embeds_ref, wih_ref, whh_ref, b_ref, wout_ref, bout_ref,
                       out_ref, hs_ref):
    T, H = hs_ref.shape
    G = 4 * H

    # One MXU matmul covering every timestep's input->hidden contribution (+ fused bias).
    x_gates = (jnp.dot(embeds_ref[...], wih_ref[...],
                       preferred_element_type=jnp.float32)
               + b_ref[...])                                              # (T, 4H)

    whh = whh_ref[...]                                                    # (H, 4H), hoisted

    # Lane mask selecting the tanh ("g") block of the fused [i|f|g|o] gate layout.
    lane = lax.broadcasted_iota(jnp.int32, (1, G), 1)
    g_lanes = (lane >= 2 * H) & (lane < 3 * H)

    # Recurrent state stays in vregs; PyTorch default initial state is zeros.
    h = jnp.zeros((1, H), jnp.float32)
    c = jnp.zeros((1, H), jnp.float32)

    # Full static unroll of the serial recurrence (T is small and compile-time known).
    for t in range(T):
        g = x_gates[t:t + 1, :] + jnp.dot(h, whh,
                                          preferred_element_type=jnp.float32)  # (1, 4H)
        # Two full-width EUP passes (sigmoid + tanh) instead of four 32-lane ones.
        sig = jax.nn.sigmoid(g)
        th = jnp.tanh(g)
        act = jnp.where(g_lanes, th, sig)               # [sig(i)|sig(f)|tanh(g)|sig(o)]
        i_g = act[:, 0 * H:1 * H]
        f_g = act[:, 1 * H:2 * H]
        g_g = act[:, 2 * H:3 * H]
        o_g = act[:, 3 * H:4 * H]
        c = f_g * c + i_g * g_g
        h = o_g * jnp.tanh(c)
        hs_ref[pl.ds(t, 1), :] = h                      # store off the critical path

    # hidden -> tag projection over a lane-dense 128-wide padded slab + log_softmax.
    # Padded lanes carry a -1e30 bias, so they contribute exp(..) == 0 to the sum and
    # never win the max -> the normalization over the real TAG lanes is exact.
    tag = (jnp.dot(hs_ref[...], wout_ref[...], preferred_element_type=jnp.float32)
           + bout_ref[...])                                               # (T, 128)
    m = jnp.max(tag, axis=-1, keepdims=True)
    lse = jnp.log(jnp.sum(jnp.exp(tag - m), axis=-1, keepdims=True)) + m
    out_ref[...] = tag - lse


def lstm_tagger(embeds, w_ih, w_hh, b_ih, b_hh, w_out, b_out):
    """embeds: (T, E) float32. Weights in PyTorch shapes:
       w_ih (4H, E), w_hh (4H, H), b_ih/b_hh (4H,), w_out (TAG, H), b_out (TAG,)."""
    T, E = embeds.shape
    H = w_hh.shape[1]
    TAG = w_out.shape[0]
    TAGP = ((TAG + 127) // 128) * 128                  # lane-dense padded tag width

    wih_t = w_ih.T                                     # (E, 4H)
    whh_t = w_hh.T                                     # (H, 4H)
    bias = (b_ih + b_hh).reshape(1, 4 * H)             # (1, 4H)

    # Lane-dense output padding: zero weight columns, -1e30 bias in padded lanes.
    wout_t = jnp.zeros((H, TAGP), jnp.float32).at[:, :TAG].set(w_out.T)
    bout = jnp.full((1, TAGP), jnp.float32(-1e30)).at[0, :TAG].set(b_out)

    out = pl.pallas_call(
        lstm_tagger_kernel,
        out_shape=jax.ShapeDtypeStruct((T, TAGP), jnp.float32),
        in_specs=[pl.BlockSpec(memory_space=pltpu.MemorySpace.VMEM)] * 6,
        out_specs=pl.BlockSpec(memory_space=pltpu.MemorySpace.VMEM),
        scratch_shapes=[pltpu.VMEM((T, H), jnp.float32)],   # per-step hidden states
    )(embeds, wih_t, whh_t, bias, wout_t, bout)

    return out[:, :TAG]


def lstm_tagger_ref(embeds, w_ih, w_hh, b_ih, b_hh, w_out, b_out):
    """Pure-JAX reference matching torch.nn.LSTM (single layer) + Linear + log_softmax."""
    T = embeds.shape[0]
    H = w_hh.shape[1]
    dot = lambda a, b: jnp.dot(a, b, precision=lax.Precision.HIGHEST)
    h = jnp.zeros((H,), jnp.float32)
    c = jnp.zeros((H,), jnp.float32)
    hs = []
    for t in range(T):
        g = dot(embeds[t], w_ih.T) + b_ih + dot(h, w_hh.T) + b_hh
        i = jax.nn.sigmoid(g[0 * H:1 * H])
        f = jax.nn.sigmoid(g[1 * H:2 * H])
        gg = jnp.tanh(g[2 * H:3 * H])
        o = jax.nn.sigmoid(g[3 * H:4 * H])
        c = f * c + i * gg
        h = o * jnp.tanh(c)
        hs.append(h)
    tag = dot(jnp.stack(hs), w_out.T) + b_out
    return jax.nn.log_softmax(tag, axis=-1)


if __name__ == "__main__":
    # Small shapes consistent with the module's forward.
    EMBEDDING_DIM = 32
    HIDDEN_DIM = 32
    VOCAB_SIZE = 20
    TAGSET_SIZE = 8
    SEQ_LEN = 8

    key = jax.random.PRNGKey(0)
    keys = jax.random.split(key, 8)
    scale = 1.0 / jnp.sqrt(HIDDEN_DIM)

    # Deterministic parameter init (PyTorch-like uniform ranges).
    embedding = jax.random.normal(keys[0], (VOCAB_SIZE, EMBEDDING_DIM), jnp.float32)
    w_ih = jax.random.uniform(keys[1], (4 * HIDDEN_DIM, EMBEDDING_DIM), jnp.float32,
                              -scale, scale)
    w_hh = jax.random.uniform(keys[2], (4 * HIDDEN_DIM, HIDDEN_DIM), jnp.float32,
                              -scale, scale)
    b_ih = jax.random.uniform(keys[3], (4 * HIDDEN_DIM,), jnp.float32, -scale, scale)
    b_hh = jax.random.uniform(keys[4], (4 * HIDDEN_DIM,), jnp.float32, -scale, scale)
    w_out = jax.random.uniform(keys[5], (TAGSET_SIZE, HIDDEN_DIM), jnp.float32,
                               -scale, scale)
    b_out = jax.random.uniform(keys[6], (TAGSET_SIZE,), jnp.float32, -scale, scale)

    # Input sentence: token indices; embedding lookup is plain-JAX glue (gather).
    sentence = jax.random.randint(keys[7], (SEQ_LEN,), 0, VOCAB_SIZE, jnp.int32)
    embeds = jnp.take(embedding, sentence, axis=0)           # (T, E)

    tag_scores = lstm_tagger(embeds, w_ih, w_hh, b_ih, b_hh, w_out, b_out)
    jax.block_until_ready(tag_scores)

    assert tag_scores.shape == (SEQ_LEN, TAGSET_SIZE)
    # log_softmax rows must (approximately) exponentiate-sum to 1.
    row_sums = jnp.sum(jnp.exp(tag_scores), axis=1)
    assert jnp.allclose(row_sums, jnp.ones_like(row_sums), atol=1e-4)

    # Numerical check against the pure-JAX reference of the PyTorch module.
    ref = lstm_tagger_ref(embeds, w_ih, w_hh, b_ih, b_hh, w_out, b_out)
    assert jnp.allclose(tag_scores, ref, atol=2e-3, rtol=2e-3), \
        float(jnp.max(jnp.abs(tag_scores - ref)))

    print("KERNEL_OK")
</pallas_src>

<mosaic_0001>
module attributes {stable_mosaic.version = 11 : i64} {
  func.func @lstm_tagger_kernel(%arg0: memref<8x32xf32, #tpu.memory_space<vmem>>, %arg1: memref<32x128xf32, #tpu.memory_space<vmem>>, %arg2: memref<32x128xf32, #tpu.memory_space<vmem>>, %arg3: memref<1x128xf32, #tpu.memory_space<vmem>>, %arg4: memref<32x128xf32, #tpu.memory_space<vmem>>, %arg5: memref<1x128xf32, #tpu.memory_space<vmem>>, %arg6: memref<8x128xf32, #tpu.memory_space<vmem>>, %arg7: memref<8x32xf32, #tpu.memory_space<vmem>>) attributes {dimension_semantics = [], scalar_prefetch = 0 : i64, scratch_operands = 1 : i64, tpu.core_type = #tpu.core_type<tc>} {
    %c0 = arith.constant 0 : index
    %c0_0 = arith.constant 0 : index
    %0 = vector.load %arg0[%c0, %c0_0] : memref<8x32xf32, #tpu.memory_space<vmem>>, vector<8x32xf32>
    %c0_1 = arith.constant 0 : index
    %c0_2 = arith.constant 0 : index
    %1 = vector.load %arg1[%c0_1, %c0_2] : memref<32x128xf32, #tpu.memory_space<vmem>>, vector<32x128xf32>
    %cst = arith.constant dense<0.000000e+00> : vector<8x128xf32>
    %2 = tpu.matmul %0, %1, %cst {dimension_numbers = #tpu.dot_dimension_numbers<[1], [0], [0], [1], [0, 0, 1, 1], [], []>} : vector<8x32xf32>, vector<32x128xf32>, vector<8x128xf32> -> vector<8x128xf32>
    %c0_3 = arith.constant 0 : index
    %c0_4 = arith.constant 0 : index
    %3 = vector.load %arg3[%c0_3, %c0_4] : memref<1x128xf32, #tpu.memory_space<vmem>>, vector<1x128xf32>
    %4 = vector.broadcast %3 : vector<1x128xf32> to vector<8x128xf32>
    %5 = arith.addf %2, %4 : vector<8x128xf32>
    %c0_5 = arith.constant 0 : index
    %c0_6 = arith.constant 0 : index
    %6 = vector.load %arg2[%c0_5, %c0_6] : memref<32x128xf32, #tpu.memory_space<vmem>>, vector<32x128xf32>
    %7 = tpu.iota {dimensions = array<i32: 1>} : vector<1x128xi32>
    %c64_i32 = arith.constant 64 : i32
    %8 = vector.broadcast %c64_i32 : i32 to vector<1x128xi32>
    %9 = arith.cmpi sge, %7, %8 : vector<1x128xi32>
    %c96_i32 = arith.constant 96 : i32
    %10 = vector.broadcast %c96_i32 : i32 to vector<1x128xi32>
    %11 = arith.cmpi slt, %7, %10 : vector<1x128xi32>
    %12 = arith.andi %9, %11 : vector<1x128xi1>
    %cst_7 = arith.constant 0.000000e+00 : f32
    %13 = vector.broadcast %cst_7 : f32 to vector<1x32xf32>
    %cst_8 = arith.constant 0.000000e+00 : f32
    %14 = vector.broadcast %cst_8 : f32 to vector<1x32xf32>
    %15 = vector.extract_strided_slice %5 {offsets = [0, 0], sizes = [1, 128], strides = [1, 1]} : vector<8x128xf32> to vector<1x128xf32>
    %cst_9 = arith.constant dense<0.000000e+00> : vector<1x128xf32>
    %16 = tpu.matmul %13, %6, %cst_9 {dimension_numbers = #tpu.dot_dimension_numbers<[1], [0], [0], [1], [0, 0, 1, 1], [], []>} : vector<1x32xf32>, vector<32x128xf32>, vector<1x128xf32> -> vector<1x128xf32>
    %17 = arith.addf %15, %16 : vector<1x128xf32>
    %18 = arith.negf %17 : vector<1x128xf32>
    %19 = math.exp %18 : vector<1x128xf32>
    %cst_10 = arith.constant 1.000000e+00 : f32
    %20 = vector.broadcast %cst_10 : f32 to vector<1x128xf32>
    %21 = arith.addf %20, %19 : vector<1x128xf32>
    %22 = arith.divf %20, %21 : vector<1x128xf32>
    %23 = math.tanh %17 : vector<1x128xf32>
    %24 = arith.select %12, %23, %22 : vector<1x128xi1>, vector<1x128xf32>
    %25 = vector.extract_strided_slice %24 {offsets = [0, 0], sizes = [1, 32], strides = [1, 1]} : vector<1x128xf32> to vector<1x32xf32>
    %26 = vector.extract_strided_slice %24 {offsets = [0, 32], sizes = [1, 32], strides = [1, 1]} : vector<1x128xf32> to vector<1x32xf32>
    %27 = vector.extract_strided_slice %24 {offsets = [0, 64], sizes = [1, 32], strides = [1, 1]} : vector<1x128xf32> to vector<1x32xf32>
    %28 = vector.extract_strided_slice %24 {offsets = [0, 96], sizes = [1, 32], strides = [1, 1]} : vector<1x128xf32> to vector<1x32xf32>
    %29 = arith.mulf %26, %14 : vector<1x32xf32>
    %30 = arith.mulf %25, %27 : vector<1x32xf32>
    %31 = arith.addf %29, %30 : vector<1x32xf32>
    %32 = math.tanh %31 : vector<1x32xf32>
    %33 = arith.mulf %28, %32 : vector<1x32xf32>
    %c0_11 = arith.constant 0 : index
    %c0_12 = arith.constant 0 : index
    %34 = vector.load %arg7[%c0_11, %c0_12] : memref<8x32xf32, #tpu.memory_space<vmem>>, vector<1x32xf32>
    tpu.vector_store %arg7[%c0_11, %c0_12], %33 {strides = array<i32>} : memref<8x32xf32, #tpu.memory_space<vmem>>, vector<1x32xf32>,
    %35 = vector.extract_strided_slice %5 {offsets = [1, 0], sizes = [1, 128], strides = [1, 1]} : vector<8x128xf32> to vector<1x128xf32>
    %cst_13 = arith.constant dense<0.000000e+00> : vector<1x128xf32>
    %36 = tpu.matmul %33, %6, %cst_13 {dimension_numbers = #tpu.dot_dimension_numbers<[1], [0], [0], [1], [0, 0, 1, 1], [], []>} : vector<1x32xf32>, vector<32x128xf32>, vector<1x128xf32> -> vector<1x128xf32>
    %37 = arith.addf %35, %36 : vector<1x128xf32>
    %38 = arith.negf %37 : vector<1x128xf32>
    %39 = math.exp %38 : vector<1x128xf32>
    %cst_14 = arith.constant 1.000000e+00 : f32
    %40 = vector.broadcast %cst_14 : f32 to vector<1x128xf32>
    %41 = arith.addf %40, %39 : vector<1x128xf32>
    %42 = arith.divf %40, %41 : vector<1x128xf32>
    %43 = math.tanh %37 : vector<1x128xf32>
    %44 = arith.select %12, %43, %42 : vector<1x128xi1>, vector<1x128xf32>
    %45 = vector.extract_strided_slice %44 {offsets = [0, 0], sizes = [1, 32], strides = [1, 1]} : vector<1x128xf32> to vector<1x32xf32>
    %46 = vector.extract_strided_slice %44 {offsets = [0, 32], sizes = [1, 32], strides = [1, 1]} : vector<1x128xf32> to vector<1x32xf32>
    %47 = vector.extract_strided_slice %44 {offsets = [0, 64], sizes = [1, 32], strides = [1, 1]} : vector<1x128xf32> to vector<1x32xf32>
    %48 = vector.extract_strided_slice %44 {offsets = [0, 96], sizes = [1, 32], strides = [1, 1]} : vector<1x128xf32> to vector<1x32xf32>
    %49 = arith.mulf %46, %31 : vector<1x32xf32>
    %50 = arith.mulf %45, %47 : vector<1x32xf32>
    %51 = arith.addf %49, %50 : vector<1x32xf32>
    %52 = math.tanh %51 : vector<1x32xf32>
    %53 = arith.mulf %48, %52 : vector<1x32xf32>
    %c1 = arith.constant 1 : index
    %c0_15 = arith.constant 0 : index
    %54 = vector.load %arg7[%c1, %c0_15] : memref<8x32xf32, #tpu.memory_space<vmem>>, vector<1x32xf32>
    tpu.vector_store %arg7[%c1, %c0_15], %53 {strides = array<i32>} : memref<8x32xf32, #tpu.memory_space<vmem>>, vector<1x32xf32>,
    %55 = vector.extract_strided_slice %5 {offsets = [2, 0], sizes = [1, 128], strides = [1, 1]} : vector<8x128xf32> to vector<1x128xf32>
    %cst_16 = arith.constant dense<0.000000e+00> : vector<1x128xf32>
    %56 = tpu.matmul %53, %6, %cst_16 {dimension_numbers = #tpu.dot_dimension_numbers<[1], [0], [0], [1], [0, 0, 1, 1], [], []>} : vector<1x32xf32>, vector<32x128xf32>, vector<1x128xf32> -> vector<1x128xf32>
    %57 = arith.addf %55, %56 : vector<1x128xf32>
    %58 = arith.negf %57 : vector<1x128xf32>
    %59 = math.exp %58 : vector<1x128xf32>
    %cst_17 = arith.constant 1.000000e+00 : f32
    %60 = vector.broadcast %cst_17 : f32 to vector<1x128xf32>
    %61 = arith.addf %60, %59 : vector<1x128xf32>
    %62 = arith.divf %60, %61 : vector<1x128xf32>
    %63 = math.tanh %57 : vector<1x128xf32>
    %64 = arith.select %12, %63, %62 : vector<1x128xi1>, vector<1x128xf32>
    %65 = vector.extract_strided_slice %64 {offsets = [0, 0], sizes = [1, 32], strides = [1, 1]} : vector<1x128xf32> to vector<1x32xf32>
    %66 = vector.extract_strided_slice %64 {offsets = [0, 32], sizes = [1, 32], strides = [1, 1]} : vector<1x128xf32> to vector<1x32xf32>
    %67 = vector.extract_strided_slice %64 {offsets = [0, 64], sizes = [1, 32], strides = [1, 1]} : vector<1x128xf32> to vector<1x32xf32>
    %68 = vector.extract_strided_slice %64 {offsets = [0, 96], sizes = [1, 32], strides = [1, 1]} : vector<1x128xf32> to vector<1x32xf32>
    %69 = arith.mulf %66, %51 : vector<1x32xf32>
    %70 = arith.mulf %65, %67 : vector<1x32xf32>
    %71 = arith.addf %69, %70 : vector<1x32xf32>
    %72 = math.tanh %71 : vector<1x32xf32>
    %73 = arith.mulf %68, %72 : vector<1x32xf32>
    %c2 = arith.constant 2 : index
    %c0_18 = arith.constant 0 : index
    %74 = vector.load %arg7[%c2, %c0_18] : memref<8x32xf32, #tpu.memory_space<vmem>>, vector<1x32xf32>
    tpu.vector_store %arg7[%c2, %c0_18], %73 {strides = array<i32>} : memref<8x32xf32, #tpu.memory_space<vmem>>, vector<1x32xf32>,
    %75 = vector.extract_strided_slice %5 {offsets = [3, 0], sizes = [1, 128], strides = [1, 1]} : vector<8x128xf32> to vector<1x128xf32>
    %cst_19 = arith.constant dense<0.000000e+00> : vector<1x128xf32>
    %76 = tpu.matmul %73, %6, %cst_19 {dimension_numbers = #tpu.dot_dimension_numbers<[1], [0], [0], [1], [0, 0, 1, 1], [], []>} : vector<1x32xf32>, vector<32x128xf32>, vector<1x128xf32> -> vector<1x128xf32>
    %77 = arith.addf %75, %76 : vector<1x128xf32>
    %78 = arith.negf %77 : vector<1x128xf32>
    %79 = math.exp %78 : vector<1x128xf32>
    %cst_20 = arith.constant 1.000000e+00 : f32
    %80 = vector.broadcast %cst_20 : f32 to vector<1x128xf32>
    %81 = arith.addf %80, %79 : vector<1x128xf32>
    %82 = arith.divf %80, %81 : vector<1x128xf32>
    %83 = math.tanh %77 : vector<1x128xf32>
    %84 = arith.select %12, %83, %82 : vector<1x128xi1>, vector<1x128xf32>
    %85 = vector.extract_strided_slice %84 {offsets = [0, 0], sizes = [1, 32], strides = [1, 1]} : vector<1x128xf32> to vector<1x32xf32>
    %86 = vector.extract_strided_slice %84 {offsets = [0, 32], sizes = [1, 32], strides = [1, 1]} : vector<1x128xf32> to vector<1x32xf32>
    %87 = vector.extract_strided_slice %84 {offsets = [0, 64], sizes = [1, 32], strides = [1, 1]} : vector<1x128xf32> to vector<1x32xf32>
    %88 = vector.extract_strided_slice %84 {offsets = [0, 96], sizes = [1, 32], strides = [1, 1]} : vector<1x128xf32> to vector<1x32xf32>
    %89 = arith.mulf %86, %71 : vector<1x32xf32>
    %90 = arith.mulf %85, %87 : vector<1x32xf32>
    %91 = arith.addf %89, %90 : vector<1x32xf32>
    %92 = math.tanh %91 : vector<1x32xf32>
    %93 = arith.mulf %88, %92 : vector<1x32xf32>
    %c3 = arith.constant 3 : index
    %c0_21 = arith.constant 0 : index
    %94 = vector.load %arg7[%c3, %c0_21] : memref<8x32xf32, #tpu.memory_space<vmem>>, vector<1x32xf32>
    tpu.vector_store %arg7[%c3, %c0_21], %93 {strides = array<i32>} : memref<8x32xf32, #tpu.memory_space<vmem>>, vector<1x32xf32>,
    %95 = vector.extract_strided_slice %5 {offsets = [4, 0], sizes = [1, 128], strides = [1, 1]} : vector<8x128xf32> to vector<1x128xf32>
    %cst_22 = arith.constant dense<0.000000e+00> : vector<1x128xf32>
    %96 = tpu.matmul %93, %6, %cst_22 {dimension_numbers = #tpu.dot_dimension_numbers<[1], [0], [0], [1], [0, 0, 1, 1], [], []>} : vector<1x32xf32>, vector<32x128xf32>, vector<1x128xf32> -> vector<1x128xf32>
    %97 = arith.addf %95, %96 : vector<1x128xf32>
    %98 = arith.negf %97 : vector<1x128xf32>
    %99 = math.exp %98 : vector<1x128xf32>
    %cst_23 = arith.constant 1.000000e+00 : f32
    %100 = vector.broadcast %cst_23 : f32 to vector<1x128xf32>
    %101 = arith.addf %100, %99 : vector<1x128xf32>
    %102 = arith.divf %100, %101 : vector<1x128xf32>
    %103 = math.tanh %97 : vector<1x128xf32>
    %104 = arith.select %12, %103, %102 : vector<1x128xi1>, vector<1x128xf32>
    %105 = vector.extract_strided_slice %104 {offsets = [0, 0], sizes = [1, 32], strides = [1, 1]} : vector<1x128xf32> to vector<1x32xf32>
    %106 = vector.extract_strided_slice %104 {offsets = [0, 32], sizes = [1, 32], strides = [1, 1]} : vector<1x128xf32> to vector<1x32xf32>
    %107 = vector.extract_strided_slice %104 {offsets = [0, 64], sizes = [1, 32], strides = [1, 1]} : vector<1x128xf32> to vector<1x32xf32>
    %108 = vector.extract_strided_slice %104 {offsets = [0, 96], sizes = [1, 32], strides = [1, 1]} : vector<1x128xf32> to vector<1x32xf32>
    %109 = arith.mulf %106, %91 : vector<1x32xf32>
    %110 = arith.mulf %105, %107 : vector<1x32xf32>
    %111 = arith.addf %109, %110 : vector<1x32xf32>
    %112 = math.tanh %111 : vector<1x32xf32>
    %113 = arith.mulf %108, %112 : vector<1x32xf32>
    %c4 = arith.constant 4 : index
    %c0_24 = arith.constant 0 : index
    %114 = vector.load %arg7[%c4, %c0_24] : memref<8x32xf32, #tpu.memory_space<vmem>>, vector<1x32xf32>
    tpu.vector_store %arg7[%c4, %c0_24], %113 {strides = array<i32>} : memref<8x32xf32, #tpu.memory_space<vmem>>, vector<1x32xf32>,
    %115 = vector.extract_strided_slice %5 {offsets = [5, 0], sizes = [1, 128], strides = [1, 1]} : vector<8x128xf32> to vector<1x128xf32>
    %cst_25 = arith.constant dense<0.000000e+00> : vector<1x128xf32>
    %116 = tpu.matmul %113, %6, %cst_25 {dimension_numbers = #tpu.dot_dimension_numbers<[1], [0], [0], [1], [0, 0, 1, 1], [], []>} : vector<1x32xf32>, vector<32x128xf32>, vector<1x128xf32> -> vector<1x128xf32>
    %117 = arith.addf %115, %116 : vector<1x128xf32>
    %118 = arith.negf %117 : vector<1x128xf32>
    %119 = math.exp %118 : vector<1x128xf32>
    %cst_26 = arith.constant 1.000000e+00 : f32
    %120 = vector.broadcast %cst_26 : f32 to vector<1x128xf32>
    %121 = arith.addf %120, %119 : vector<1x128xf32>
    %122 = arith.divf %120, %121 : vector<1x128xf32>
    %123 = math.tanh %117 : vector<1x128xf32>
    %124 = arith.select %12, %123, %122 : vector<1x128xi1>, vector<1x128xf32>
    %125 = vector.extract_strided_slice %124 {offsets = [0, 0], sizes = [1, 32], strides = [1, 1]} : vector<1x128xf32> to vector<1x32xf32>
    %126 = vector.extract_strided_slice %124 {offsets = [0, 32], sizes = [1, 32], strides = [1, 1]} : vector<1x128xf32> to vector<1x32xf32>
    %127 = vector.extract_strided_slice %124 {offsets = [0, 64], sizes = [1, 32], strides = [1, 1]} : vector<1x128xf32> to vector<1x32xf32>
    %128 = vector.extract_strided_slice %124 {offsets = [0, 96], sizes = [1, 32], strides = [1, 1]} : vector<1x128xf32> to vector<1x32xf32>
    %129 = arith.mulf %126, %111 : vector<1x32xf32>
    %130 = arith.mulf %125, %127 : vector<1x32xf32>
    %131 = arith.addf %129, %130 : vector<1x32xf32>
    %132 = math.tanh %131 : vector<1x32xf32>
    %133 = arith.mulf %128, %132 : vector<1x32xf32>
    %c5 = arith.constant 5 : index
    %c0_27 = arith.constant 0 : index
    %134 = vector.load %arg7[%c5, %c0_27] : memref<8x32xf32, #tpu.memory_space<vmem>>, vector<1x32xf32>
    tpu.vector_store %arg7[%c5, %c0_27], %133 {strides = array<i32>} : memref<8x32xf32, #tpu.memory_space<vmem>>, vector<1x32xf32>,
    %135 = vector.extract_strided_slice %5 {offsets = [6, 0], sizes = [1, 128], strides = [1, 1]} : vector<8x128xf32> to vector<1x128xf32>
    %cst_28 = arith.constant dense<0.000000e+00> : vector<1x128xf32>
    %136 = tpu.matmul %133, %6, %cst_28 {dimension_numbers = #tpu.dot_dimension_numbers<[1], [0], [0], [1], [0, 0, 1, 1], [], []>} : vector<1x32xf32>, vector<32x128xf32>, vector<1x128xf32> -> vector<1x128xf32>
    %137 = arith.addf %135, %136 : vector<1x128xf32>
    %138 = arith.negf %137 : vector<1x128xf32>
    %139 = math.exp %138 : vector<1x128xf32>
    %cst_29 = arith.constant 1.000000e+00 : f32
    %140 = vector.broadcast %cst_29 : f32 to vector<1x128xf32>
    %141 = arith.addf %140, %139 : vector<1x128xf32>
    %142 = arith.divf %140, %141 : vector<1x128xf32>
    %143 = math.tanh %137 : vector<1x128xf32>
    %144 = arith.select %12, %143, %142 : vector<1x128xi1>, vector<1x128xf32>
    %145 = vector.extract_strided_slice %144 {offsets = [0, 0], sizes = [1, 32], strides = [1, 1]} : vector<1x128xf32> to vector<1x32xf32>
    %146 = vector.extract_strided_slice %144 {offsets = [0, 32], sizes = [1, 32], strides = [1, 1]} : vector<1x128xf32> to vector<1x32xf32>
    %147 = vector.extract_strided_slice %144 {offsets = [0, 64], sizes = [1, 32], strides = [1, 1]} : vector<1x128xf32> to vector<1x32xf32>
    %148 = vector.extract_strided_slice %144 {offsets = [0, 96], sizes = [1, 32], strides = [1, 1]} : vector<1x128xf32> to vector<1x32xf32>
    %149 = arith.mulf %146, %131 : vector<1x32xf32>
    %150 = arith.mulf %145, %147 : vector<1x32xf32>
    %151 = arith.addf %149, %150 : vector<1x32xf32>
    %152 = math.tanh %151 : vector<1x32xf32>
    %153 = arith.mulf %148, %152 : vector<1x32xf32>
    %c6 = arith.constant 6 : index
    %c0_30 = arith.constant 0 : index
    %154 = vector.load %arg7[%c6, %c0_30] : memref<8x32xf32, #tpu.memory_space<vmem>>, vector<1x32xf32>
    tpu.vector_store %arg7[%c6, %c0_30], %153 {strides = array<i32>} : memref<8x32xf32, #tpu.memory_space<vmem>>, vector<1x32xf32>,
    %155 = vector.extract_strided_slice %5 {offsets = [7, 0], sizes = [1, 128], strides = [1, 1]} : vector<8x128xf32> to vector<1x128xf32>
    %cst_31 = arith.constant dense<0.000000e+00> : vector<1x128xf32>
    %156 = tpu.matmul %153, %6, %cst_31 {dimension_numbers = #tpu.dot_dimension_numbers<[1], [0], [0], [1], [0, 0, 1, 1], [], []>} : vector<1x32xf32>, vector<32x128xf32>, vector<1x128xf32> -> vector<1x128xf32>
    %157 = arith.addf %155, %156 : vector<1x128xf32>
    %158 = arith.negf %157 : vector<1x128xf32>
    %159 = math.exp %158 : vector<1x128xf32>
    %cst_32 = arith.constant 1.000000e+00 : f32
    %160 = vector.broadcast %cst_32 : f32 to vector<1x128xf32>
    %161 = arith.addf %160, %159 : vector<1x128xf32>
    %162 = arith.divf %160, %161 : vector<1x128xf32>
    %163 = math.tanh %157 : vector<1x128xf32>
    %164 = arith.select %12, %163, %162 : vector<1x128xi1>, vector<1x128xf32>
    %165 = vector.extract_strided_slice %164 {offsets = [0, 0], sizes = [1, 32], strides = [1, 1]} : vector<1x128xf32> to vector<1x32xf32>
    %166 = vector.extract_strided_slice %164 {offsets = [0, 32], sizes = [1, 32], strides = [1, 1]} : vector<1x128xf32> to vector<1x32xf32>
    %167 = vector.extract_strided_slice %164 {offsets = [0, 64], sizes = [1, 32], strides = [1, 1]} : vector<1x128xf32> to vector<1x32xf32>
    %168 = vector.extract_strided_slice %164 {offsets = [0, 96], sizes = [1, 32], strides = [1, 1]} : vector<1x128xf32> to vector<1x32xf32>
    %169 = arith.mulf %166, %151 : vector<1x32xf32>
    %170 = arith.mulf %165, %167 : vector<1x32xf32>
    %171 = arith.addf %169, %170 : vector<1x32xf32>
    %172 = math.tanh %171 : vector<1x32xf32>
    %173 = arith.mulf %168, %172 : vector<1x32xf32>
    %c7 = arith.constant 7 : index
    %c0_33 = arith.constant 0 : index
    %174 = vector.load %arg7[%c7, %c0_33] : memref<8x32xf32, #tpu.memory_space<vmem>>, vector<1x32xf32>
    tpu.vector_store %arg7[%c7, %c0_33], %173 {strides = array<i32>} : memref<8x32xf32, #tpu.memory_space<vmem>>, vector<1x32xf32>,
    %c0_34 = arith.constant 0 : index
    %c0_35 = arith.constant 0 : index
    %175 = vector.load %arg7[%c0_34, %c0_35] : memref<8x32xf32, #tpu.memory_space<vmem>>, vector<8x32xf32>
    %c0_36 = arith.constant 0 : index
    %c0_37 = arith.constant 0 : index
    %176 = vector.load %arg4[%c0_36, %c0_37] : memref<32x128xf32, #tpu.memory_space<vmem>>, vector<32x128xf32>
    %cst_38 = arith.constant dense<0.000000e+00> : vector<8x128xf32>
    %177 = tpu.matmul %175, %176, %cst_38 {dimension_numbers = #tpu.dot_dimension_numbers<[1], [0], [0], [1], [0, 0, 1, 1], [], []>} : vector<8x32xf32>, vector<32x128xf32>, vector<8x128xf32> -> vector<8x128xf32>
    %c0_39 = arith.constant 0 : index
    %c0_40 = arith.constant 0 : index
    %178 = vector.load %arg5[%c0_39, %c0_40] : memref<1x128xf32, #tpu.memory_space<vmem>>, vector<1x128xf32>
    %179 = vector.broadcast %178 : vector<1x128xf32> to vector<8x128xf32>
    %180 = arith.addf %177, %179 : vector<8x128xf32>
    %cst_41 = arith.constant dense<0xFF800000> : vector<8xf32>
    %181 = vector.multi_reduction <maximumf>, %180, %cst_41 [1] : vector<8x128xf32> to vector<8xf32>
    %182 = vector.shape_cast %181 : vector<8xf32> to vector<8x1xf32>
    %183 = vector.broadcast %182 : vector<8x1xf32> to vector<8x128xf32>
    %184 = arith.subf %180, %183 : vector<8x128xf32>
    %185 = math.exp %184 : vector<8x128xf32>
    %cst_42 = arith.constant dense<0.000000e+00> : vector<8xf32>
    %186 = vector.multi_reduction <add>, %185, %cst_42 [1] : vector<8x128xf32> to vector<8xf32>
    %187 = vector.shape_cast %186 : vector<8xf32> to vector<8x1xf32>
    %188 = math.log %187 : vector<8x1xf32>
    %189 = arith.addf %188, %182 : vector<8x1xf32>
    %190 = vector.broadcast %189 : vector<8x1xf32> to vector<8x128xf32>
    %191 = arith.subf %180, %190 : vector<8x128xf32>
    %c0_43 = arith.constant 0 : index
    %c0_44 = arith.constant 0 : index
    %192 = vector.load %arg6[%c0_43, %c0_44] : memref<8x128xf32, #tpu.memory_space<vmem>>, vector<8x128xf32>
    tpu.vector_store %arg6[%c0_43, %c0_44], %191 {strides = array<i32>} : memref<8x128xf32, #tpu.memory_space<vmem>>, vector<8x128xf32>,
    return
  }
}

</mosaic_0001>

<bundles_post_ra>
// kernel: tpu_custom_call.1
= control target key start
LH: loop header
LB: loop body
LE: loop exit
PB: predicated region body
PF: predicated region fallthrough
CT: control target
= control target key end

     0   :  { %11 = vsyncpa [#allocation4], 0  ;;  %s1892_s0 = inlined_call_operand.hbm [shape: f32[8,32], index: 0, kind: input, shape index: {}]   ;;  %s1893_s1 = inlined_call_operand.hbm [shape: f32[32,128], index: 1, kind: input, shape index: {}]   ;;  %s1894_s2 = inlined_call_operand.hbm [shape: f32[32,128], index: 2, kind: input, shape index: {}]   ;;  %s1895_s3 = inlined_call_operand.vmem [shape: f32[1,128], index: 3, kind: input, shape index: {}]   ;;  %s1896_s4 = inlined_call_operand.hbm [shape: f32[32,128], index: 4, kind: input, shape index: {}]   ;;  %s1897_s5 = inlined_call_operand.vmem [shape: f32[1,128], index: 5, kind: input, shape index: {}]   ;;  %s1898_s6 = inlined_call_operand.hbm [shape: f32[8,128], index: 6, kind: output, shape index: {}]  }
   0x1   :  { %12 = vsyncpa [#allocation7], 0 }
   0x2   :  { %13 = vsyncpa [#allocation10], 0 }
   0x3   :  { %14 = vsyncpa [#allocation5], 0  ;;  %s1616_s21 = smov [#allocation6]   ;;  %s1498_s25 = scalar_lea.hbm %s1893_s1, 512 }
   0x4   :  { %s30_s22 = sshll.u32 %s1616_s21, 4  ;;  %p1499_p0 = scmp.ne.s32.totalorder %s1893_s1, %s1498_s25  ;;  %s31_s22 = int_to_ptr.vmem [resolvable:$true] %s30_s22 }
   0x5   :  { %p1502_p1 = scmp.lt.u32.totalorder %s1498_s25, %s1893_s1 }
   0x7   :  { %p1504_p2 = pnand %p1502_p1, %p1499_p0 }
   0x9   :  { %1507 = shalt.err (!%p1504_p2)
}
   0xa   :  { %s1508_s30 = scalar_lea.vmem %s31_s22, 512  ;;  %p1513_p4 = scmp.lt.s32.totalorder %s31_s22, %s31_s22 }
   0xb   :  { %p1509_p3 = scmp.ne.s32.totalorder %s31_s22, %s1508_s30  ;;  %p1514_p5 = scmp.lt.s32.totalorder %s1508_s30, %s1508_s30 }
   0xd   :  { %p1515_p6 = por %p1514_p5, %p1513_p4 }
   0xf   :  { %p1516_p7 = pnand %p1515_p6, %p1509_p3 }
  0x11   :  { %1519 = shalt.err (!%p1516_p7)
}
  0x12   :  { %s1617_s7 = smov 128   ;;  %s1618_s8 = smov 8  }
  0x13   :  { %36 = dma.hbm_to_vmem [thread:$0]  %s1893_s1, 512, %s31_s22, [#allocation7], %s1617_s7, %s1617_s7, %s1618_s8  }
  0x14   :  { %s1619_s11 = smov [#allocation3]   ;;  %s1620_s13 = smov [#allocation8]  }
  0x15   :  { %s21_s12 = sshll.u32 %s1619_s11, 4  ;;  %s42_s14 = sshll.u32 %s1620_s13, 4  ;;  %s22_s12 = int_to_ptr.vmem [resolvable:$true] %s21_s12  ;;  %s43_s14 = int_to_ptr.vmem [resolvable:$true] %s42_s14 }
  0x16   :  { %s1520_s17 = scalar_lea.hbm %s1892_s0, 128 }
  0x17   :  { %p1521_p8 = scmp.ne.s32.totalorder %s1892_s0, %s1520_s17  ;;  %p1524_p9 = scmp.lt.u32.totalorder %s1520_s17, %s1892_s0 }
  0x19   :  { %p1526_p10 = pnand %p1524_p9, %p1521_p8 }
  0x1b   :  { %1529 = shalt.err (!%p1526_p10)
}
  0x1c   :  { %s1530_s1 = scalar_lea.vmem %s22_s12, 128  ;;  %p1535_p12 = scmp.lt.s32.totalorder %s22_s12, %s22_s12 }
  0x1d   :  { %p1531_p11 = scmp.ne.s32.totalorder %s22_s12, %s1530_s1  ;;  %p1536_p13 = scmp.lt.s32.totalorder %s1530_s1, %s1530_s1 }
  0x1f   :  { %p1537_p0 = por %p1536_p13, %p1535_p12 }
  0x21   :  { %p1538_p1 = pnand %p1537_p0, %p1531_p11 }
  0x23   :  { %1541 = shalt.err (!%p1538_p1)
}
  0x24   :  { %24 = dma.hbm_to_vmem [thread:$0]  %s1892_s0, 128, %s22_s12, [#allocation4]  }
  0x25   :  { %s1542_s26 = scalar_lea.hbm %s1894_s2, 512 }
  0x26   :  { %p1543_p2 = scmp.ne.s32.totalorder %s1894_s2, %s1542_s26  ;;  %p1546_p3 = scmp.lt.u32.totalorder %s1542_s26, %s1894_s2 }
  0x28   :  { %p1548_p4 = pnand %p1546_p3, %p1543_p2 }
  0x2a   :  { %1551 = shalt.err (!%p1548_p4)
}
  0x2b   :  { %s1552_s9 = scalar_lea.vmem %s43_s14, 512  ;;  %p1557_p6 = scmp.lt.s32.totalorder %s43_s14, %s43_s14 }
  0x2c   :  { %p1553_p5 = scmp.ne.s32.totalorder %s43_s14, %s1552_s9  ;;  %p1558_p7 = scmp.lt.s32.totalorder %s1552_s9, %s1552_s9 }
  0x2e   :  { %p1559_p8 = por %p1558_p7, %p1557_p6 }
  0x30   :  { %p1560_p9 = pnand %p1559_p8, %p1553_p5 }
  0x32   :  { %1563 = shalt.err (!%p1560_p9)
}
  0x33   :  { %48 = dma.hbm_to_vmem [thread:$0]  %s1894_s2, 512, %s43_s14, [#allocation7], %s1617_s7, %s1617_s7, %s1618_s8  }
  0x34   :  { %s1621_s11 = smov [#allocation9]   ;;  %s1564_s16 = scalar_lea.hbm %s1896_s4, 512 }
  0x35   :  { %s56_s12 = sshll.u32 %s1621_s11, 4  ;;  %p1565_p10 = scmp.ne.s32.totalorder %s1896_s4, %s1564_s16  ;;  %s57_s12 = int_to_ptr.vmem [resolvable:$true] %s56_s12 }
  0x36   :  { %p1568_p11 = scmp.lt.u32.totalorder %s1564_s16, %s1896_s4 }
  0x38   :  { %p1570_p12 = pnand %p1568_p11, %p1565_p10 }
  0x3a   :  { %1573 = shalt.err (!%p1570_p12)
}
  0x3b   :  { %s1574_s21 = scalar_lea.vmem %s57_s12, 512  ;;  %p1579_p0 = scmp.lt.s32.totalorder %s57_s12, %s57_s12 }
  0x3c   :  { %p1575_p13 = scmp.ne.s32.totalorder %s57_s12, %s1574_s21  ;;  %p1580_p1 = scmp.lt.s32.totalorder %s1574_s21, %s1574_s21 }
  0x3e   :  { %p1581_p2 = por %p1580_p1, %p1579_p0 }
  0x40   :  { %p1582_p3 = pnand %p1581_p2, %p1575_p13 }
  0x42   :  { %1585 = shalt.err (!%p1582_p3)
}
  0x43   :  { %62 = dma.hbm_to_vmem [thread:$0]  %s1896_s4, 512, %s57_s12, [#allocation10], %s1617_s7, %s1617_s7, %s1618_s8  }
  0x44   :  { %1608 = dma.done.wait [#allocation4], 128  }
  0x45   :  { %1609 = vsyncadd [#allocation4], 4294967168 }
  0x46   :  { %1610 = dma.done.wait [#allocation7], 1024  }
  0x47   :  { %1611 = vsyncadd [#allocation7], 4294966272 }
  0x48   :  { %1612 = dma.done.wait [#allocation10], 512  }
  0x49   :  { %1613 = vsyncadd [#allocation10], 4294966784  ;;  %v1622_v0 = vmov 0.0|0.0   ;;  %vm1623_vm0 = vmmov 0   ;;  %v1624_v1 = vmov 0.0   ;;  %v78_v2 = vld [vmem:[#allocation6] sm:$0xff]  ;;  %v167_v24 = vlaneseq }
  0x4a   :  { %1358 = vmatprep.subr.bf16.mxu0 %v1622_v0  ;;  %1364 = vmatprep.subr.bf16.mxu1 %v1622_v0  ;;  %v79_v3 = vld [vmem:[#allocation6 + $0x8] sm:$0xff]  ;;  %v163_v4 = vld [vmem:[#allocation8] sm:$0xff]  ;;  %v80_v7 = vld [vmem:[#allocation6 + $0x10] sm:$0xff]  ;;  %vm89_vm1 = vcmask 261120   ;;  %s1626_s8 = smov 32   ;;  %vm275_vm5 = vcmask 253952  }
  0x4b   :  { %1256 = vmatprep.mubr.msk.f32.mxu0 %vm1623_vm0, %v1624_v1  ;;  %1267 = vmatprep.mubr.msk.f32.mxu1 %vm1623_vm0, %v1624_v1  ;;  %v1359_v5 = vpack.c.bf16 %v79_v3, %v78_v2  ;;  %v164_v6 = vld [vmem:[#allocation8 + $0x8] sm:$0xff]  ;;  %v81_v8 = vld [vmem:[#allocation6 + $0x18] sm:$0xff]  ;;  %v165_v10 = vld [vmem:[#allocation8 + $0x10] sm:$0xff]  ;;  %v168_v26 = vand.u32 127, %v167_v24  ;;  %vm385_vm6 = vcmask 254977   ;;  %vm611_vm7 = vcmask 257027  }
  0x4c   :  { %v1726_v9 = vpack.c.bf16 %v164_v6, %v163_v4  ;;  %v166_v11 = vld [vmem:[#allocation8 + $0x18] sm:$0xff]  ;;  %v1362_v12 = vpack.c.bf16 %v81_v8, %v80_v7  ;;  %v1179_v15 = vld [vmem:[%s1895_s3] ss:$0 sm:$0xff]  ;;  %s1625_s3 = smov 64   ;;  %vm837_vm8 = vcmask 259077   ;;  %vm498_vm9 = vcmask 256002  }
  0x4d   :  { %1360 = vmatpush3.bf16.msra.mxu0 %v1359_v5  ;;  %v1730_v13 = vpack.c.bf16 %v166_v11, %v165_v10  ;;  %v77_v14 = vld [vmem:[#allocation3] sm:$0xff]  ;;  %vm169_vm2 = vcmp.ge.s32.totalorder %v168_v26, 64  ;;  %vm170_vm3 = vcmp.lt.s32.totalorder %v168_v26, 96  ;;  %vm724_vm10 = vcmask 258052   ;;  %s1627_s23 = smov [#allocation11]  }
  0x4e   :  { %1366 = vmatpush3.bf16.msra.mxu1 %v1726_v9  ;;  %1361 = vmatprep.subr.bf16.mxu0 %v1622_v0  ;;  %vm1756_vm4 = vmand %vm169_vm2, %vm170_vm3  ;;  %vm950_vm11 = vcmask 260102   ;;  %vm1063_vm12 = vcmask 261127   ;;  %s1168_s24 = sshll.u32 %s1627_s23, 4  ;;  %s1169_s24 = int_to_ptr.vmem [resolvable:$true] %s1168_s24 }
  0x4f   :  { %1367 = vmatprep.subr.bf16.mxu1 %v1622_v0  ;;  %p1591_p5 = scmp.lt.s32.totalorder %s1169_s24, %s1169_s24 }
  0x51   :  { %1363 = vmatpush3.bf16.msra.mxu0 %v1362_v12 }
  0x52   :  { %1369 = vmatpush3.bf16.msra.mxu1 %v1730_v13  ;;  %1370 = vmatprep.subr.bf16.mxu0 %v1622_v0 }
  0x53   :  { %1376 = vmatprep.subr.bf16.mxu1 %v1622_v0 }
  0x54   :  { %1257 = vmatmul.mubr.msk.f32.vlgmr.msra.gmra.mrb[0].mxu0 %vm89_vm1, %v77_v14 }
  0x55   :  { %1268 = vmatmul.mubr.f32.vlgmr.msra.gmra.mrb[0].mxu1 %v1624_v1  ;;  %1372 = vmatpush3.bf16.msra.mxu0 %v1726_v9 }
  0x56   :  { %1373 = vmatprep.subr.bf16.mxu0 %v1622_v0  ;;  %1278 = vmatprep.mubr.msk.f32.mxu0 %vm1623_vm0, %v1624_v1 }
  0x57   :  { %1378 = vmatpush3.bf16.msra.mxu1 %v1726_v9  ;;  %1289 = vmatprep.mubr.msk.f32.mxu1 %vm1623_vm0, %v1624_v1 }
  0x58   :  { %1379 = vmatprep.subr.bf16.mxu1 %v1622_v0 }
  0x59   :  { %1375 = vmatpush3.bf16.msra.mxu0 %v1730_v13 }
  0x5a   :  { %1382 = vmatprep.subr.bf16.mxu0 %v1622_v0 }
  0x5b   :  { %1381 = vmatpush3.bf16.msra.mxu1 %v1730_v13 }
  0x5c   :  { %1388 = vmatprep.subr.bf16.mxu1 %v1622_v0 }
 0x127   :  { %v159_v16 = vpop.f32.mrb[0].mxu0 }
 0x128   :  { %v1753_v17 = vadd.f32 %v1179_v15, %v159_v16  ;;  %v1258_v18 = vpop.f32.mrb[1].mxu0  ;;  %v241_v19 = vpop.f32.mrb[0].mxu1 }
 0x129   :  { %v1269_v20 = vpop.f32.mrb[1].mxu1 }
 0x12a   :  { %v245_v21 = vadd.f32 %v241_v19, %v1753_v17 }
 0x12c   :  { %v1181_v22 = vmul.f32 -1.442695, %v245_v21 }
 0x12e   :  { %1430 = vpow2.f32 %v1181_v22 }
 0x12f   :  { %1432 = vtanh.f32 %v245_v21 }
 0x138   :  { %v1431_v23 = vpop.eup %1430 }
 0x139   :  { %v249_v25 = vadd.f32 1.0, %v1431_v23  ;;  %v1433_v28 = vpop.eup %1432 }
 0x13b   :  { %1434 = vrcp.f32 %v249_v25 }
 0x145   :  { %v1435_v29 = vpop.eup %1434 }
 0x146   :  { %v253_v30 = vsel %vm1756_vm4, %v1433_v28, %v1435_v29 }
 0x147   :  { %256 = vrot.lane.b32.xlu0 %v253_v30, %s1625_s3  ;;  %v254_v33 = vmul.f32 0.0, %v253_v30 }
 0x1b9   :  { %v257_v31 = vpop.permute.xlu0 %256 }
 0x1ba   :  { %v259_v32 = vmul.f32 %v257_v31, %v253_v30 }
 0x1bc   :  { %261 = vrot.lane.b32.xlu0 %v259_v32, %s1626_s8 }
 0x22e   :  { %v262_v34 = vpop.permute.xlu0 %261 }
 0x22f   :  { %v264_v35 = vadd.f32 %v262_v34, %v254_v33 }
 0x231   :  { %1436 = vtanh.f32 %v264_v35  ;;  %v362_v52 = vrot.slane %v264_v35, 7 }
 0x23b   :  { %v1437_v36 = vpop.eup %1436 }
 0x23c   :  { %267 = vrot.lane.b32.xlu1 %v1437_v36, %s1625_s3 }
 0x2ae   :  { %v268_v37 = vpop.permute.xlu1 %267 }
 0x2af   :  { %v270_v38 = vmul.f32 %v268_v37, %v253_v30 }
 0x2b1   :  { %272 = vrot.lane.b32.xlu1 %v270_v38, %s1626_s8 }
 0x323   :  { %v273_v39 = vpop.permute.xlu1 %272 }
 0x324   :  { %276 = vst.msk [vmem:[#allocation2] sm:$0x1] %vm275_vm5, %v273_v39  ;;  %1279 = vmatmul.mubr.msk.f32.vlgmr.msra.gmra.mrb[2].mxu0 %vm89_vm1, %v273_v39 }
 0x325   :  { %1384 = vmatpush3.bf16.msra.mxu0 %v1726_v9  ;;  %1300 = vmatprep.mubr.msk.f32.mxu0 %vm1623_vm0, %v1624_v1 }
 0x326   :  { %1385 = vmatprep.subr.bf16.mxu0 %v1622_v0 }
 0x329   :  { %1387 = vmatpush3.bf16.msra.mxu0 %v1730_v13 }
 0x32a   :  { %1394 = vmatprep.subr.bf16.mxu0 %v1622_v0 }
 0x3f7   :  { %v345_v40 = vpop.f32.mrb[2].mxu0 }
 0x3f8   :  { %v350_v41 = vrot.slane %v345_v40, 7  ;;  %v1280_v42 = vpop.f32.mrb[3].mxu0 }
 0x3fa   :  { %v352_v43 = vadd.f32 %v350_v41, %v1753_v17 }
 0x3fc   :  { %v1183_v44 = vmul.f32 -1.442695, %v352_v43 }
 0x3fe   :  { %1438 = vpow2.f32 %v1183_v44 }
 0x3ff   :  { %1440 = vtanh.f32 %v352_v43 }
 0x408   :  { %v1439_v45 = vpop.eup %1438 }
 0x409   :  { %v356_v46 = vadd.f32 1.0, %v1439_v45  ;;  %v1441_v47 = vpop.eup %1440 }
 0x40b   :  { %1442 = vrcp.f32 %v356_v46 }
 0x415   :  { %v1443_v48 = vpop.eup %1442 }
 0x416   :  { %v360_v49 = vsel %vm1756_vm4, %v1441_v47, %v1443_v48 }
 0x417   :  { %366 = vrot.lane.b32.xlu0 %v360_v49, %s1625_s3  ;;  %v364_v53 = vmul.f32 %v362_v52, %v360_v49 }
 0x489   :  { %v367_v50 = vpop.permute.xlu0 %366 }
 0x48a   :  { %v369_v51 = vmul.f32 %v367_v50, %v360_v49 }
 0x48c   :  { %371 = vrot.lane.b32.xlu1 %v369_v51, %s1626_s8 }
 0x4fe   :  { %v372_v54 = vpop.permute.xlu1 %371 }
 0x4ff   :  { %v374_v55 = vadd.f32 %v372_v54, %v364_v53 }
 0x501   :  { %1444 = vtanh.f32 %v374_v55  ;;  %v475_v12 = vrot.slane %v374_v55, 7 }
 0x50b   :  { %v1445_v56 = vpop.eup %1444 }
 0x50c   :  { %377 = vrot.lane.b32.xlu0 %v1445_v56, %s1625_s3 }
 0x57e   :  { %v378_v57 = vpop.permute.xlu0 %377 }
 0x57f   :  { %v1779_v58 = vmul.f32 %v378_v57, %v360_v49 }
 0x581   :  { %v387_v59 = vrot.slane %v1779_v58, 1 }
 0x583   :  { %388 = vrot.lane.b32.xlu1 %v387_v59, %s1626_s8 }
 0x5f5   :  { %v389_v60 = vpop.permute.xlu1 %388 }
 0x5f6   :  { %1290 = vmatmul.mubr.msk.f32.vlgmr.msra.gmra.mrb[2].mxu1 %vm89_vm1, %v389_v60 }
 0x5f7   :  { %1390 = vmatpush3.bf16.msra.mxu1 %v1726_v9  ;;  %1311 = vmatprep.mubr.msk.f32.mxu1 %vm1623_vm0, %v1624_v1 }
 0x5f8   :  { %1391 = vmatprep.subr.bf16.mxu1 %v1622_v0 }
 0x5fb   :  { %1393 = vmatpush3.bf16.msra.mxu1 %v1730_v13 }
 0x5fc   :  { %1400 = vmatprep.subr.bf16.mxu1 %v1622_v0 }
 0x6c9   :  { %v458_v61 = vpop.f32.mrb[2].mxu1 }
 0x6ca   :  { %v463_v62 = vrot.slane %v458_v61, 6  ;;  %v1291_v63 = vpop.f32.mrb[3].mxu1 }
 0x6cc   :  { %v465_v2 = vadd.f32 %v463_v62, %v1753_v17 }
 0x6ce   :  { %v1185_v3 = vmul.f32 -1.442695, %v465_v2 }
 0x6d0   :  { %1446 = vpow2.f32 %v1185_v3 }
 0x6d1   :  { %1448 = vtanh.f32 %v465_v2 }
 0x6da   :  { %v1447_v4 = vpop.eup %1446 }
 0x6db   :  { %v469_v5 = vadd.f32 1.0, %v1447_v4  ;;  %v1449_v6 = vpop.eup %1448 }
 0x6dd   :  { %1450 = vrcp.f32 %v469_v5 }
 0x6e7   :  { %v1451_v7 = vpop.eup %1450 }
 0x6e8   :  { %v473_v8 = vsel %vm1756_vm4, %v1449_v6, %v1451_v7 }
 0x6e9   :  { %479 = vrot.lane.b32.xlu0 %v473_v8, %s1625_s3  ;;  %v477_v14 = vmul.f32 %v475_v12, %v473_v8 }
 0x75b   :  { %v480_v10 = vpop.permute.xlu0 %479 }
 0x75c   :  { %v482_v11 = vmul.f32 %v480_v10, %v473_v8 }
 0x75e   :  { %484 = vrot.lane.b32.xlu1 %v482_v11, %s1626_s8 }
 0x7d0   :  { %v485_v15 = vpop.permute.xlu1 %484 }
 0x7d1   :  { %v487_v16 = vadd.f32 %v485_v15, %v477_v14 }
 0x7d3   :  { %1452 = vtanh.f32 %v487_v16  ;;  %v588_v36 = vrot.slane %v487_v16, 7 }
 0x7dd   :  { %v1453_v18 = vpop.eup %1452 }
 0x7de   :  { %490 = vrot.lane.b32.xlu0 %v1453_v18, %s1625_s3 }
 0x850   :  { %v491_v19 = vpop.permute.xlu0 %490 }
 0x851   :  { %v1796_v20 = vmul.f32 %v491_v19, %v473_v8 }
 0x853   :  { %v500_v21 = vrot.slane %v1796_v20, 2 }
 0x855   :  { %501 = vrot.lane.b32.xlu1 %v500_v21, %s1626_s8 }
 0x8c7   :  { %v502_v22 = vpop.permute.xlu1 %501 }
 0x8c8   :  { %1301 = vmatmul.mubr.msk.f32.vlgmr.msra.gmra.mrb[4].mxu0 %vm89_vm1, %v502_v22 }
 0x8c9   :  { %1396 = vmatpush3.bf16.msra.mxu0 %v1726_v9  ;;  %1322 = vmatprep.mubr.msk.f32.mxu0 %vm1623_vm0, %v1624_v1 }
 0x8ca   :  { %1397 = vmatprep.subr.bf16.mxu0 %v1622_v0 }
 0x8cd   :  { %1399 = vmatpush3.bf16.msra.mxu0 %v1730_v13 }
 0x8ce   :  { %1406 = vmatprep.subr.bf16.mxu0 %v1622_v0 }
 0x99b   :  { %v571_v23 = vpop.f32.mrb[4].mxu0 }
 0x99c   :  { %v576_v24 = vrot.slane %v571_v23, 5  ;;  %v1302_v25 = vpop.f32.mrb[5].mxu0 }
 0x99e   :  { %v578_v26 = vadd.f32 %v576_v24, %v1753_v17 }
 0x9a0   :  { %v1187_v28 = vmul.f32 -1.442695, %v578_v26 }
 0x9a2   :  { %1454 = vpow2.f32 %v1187_v28 }
 0x9a3   :  { %1456 = vtanh.f32 %v578_v26 }
 0x9ac   :  { %v1455_v29 = vpop.eup %1454 }
 0x9ad   :  { %v582_v30 = vadd.f32 1.0, %v1455_v29  ;;  %v1457_v31 = vpop.eup %1456 }
 0x9af   :  { %1458 = vrcp.f32 %v582_v30 }
 0x9b9   :  { %v1459_v32 = vpop.eup %1458 }
 0x9ba   :  { %v586_v33 = vsel %vm1756_vm4, %v1457_v31, %v1459_v32 }
 0x9bb   :  { %592 = vrot.lane.b32.xlu0 %v586_v33, %s1625_s3  ;;  %v590_v37 = vmul.f32 %v588_v36, %v586_v33 }
 0xa2d   :  { %v593_v34 = vpop.permute.xlu0 %592 }
 0xa2e   :  { %v595_v35 = vmul.f32 %v593_v34, %v586_v33 }
 0xa30   :  { %597 = vrot.lane.b32.xlu1 %v595_v35, %s1626_s8 }
 0xaa2   :  { %v598_v38 = vpop.permute.xlu1 %597 }
 0xaa3   :  { %v600_v39 = vadd.f32 %v598_v38, %v590_v37 }
 0xaa5   :  { %1460 = vtanh.f32 %v600_v39  ;;  %v701_v57 = vrot.slane %v600_v39, 7 }
 0xaaf   :  { %v1461_v40 = vpop.eup %1460 }
 0xab0   :  { %603 = vrot.lane.b32.xlu0 %v1461_v40, %s1625_s3 }
 0xb22   :  { %v604_v41 = vpop.permute.xlu0 %603 }
 0xb23   :  { %v1813_v42 = vmul.f32 %v604_v41, %v586_v33 }
 0xb25   :  { %v613_v43 = vrot.slane %v1813_v42, 3 }
 0xb27   :  { %614 = vrot.lane.b32.xlu1 %v613_v43, %s1626_s8 }
 0xb99   :  { %v615_v44 = vpop.permute.xlu1 %614 }
 0xb9a   :  { %1312 = vmatmul.mubr.msk.f32.vlgmr.msra.gmra.mrb[4].mxu1 %vm89_vm1, %v615_v44 }
 0xb9b   :  { %1402 = vmatpush3.bf16.msra.mxu1 %v1726_v9  ;;  %1333 = vmatprep.mubr.msk.f32.mxu1 %vm1623_vm0, %v1624_v1 }
 0xb9c   :  { %1403 = vmatprep.subr.bf16.mxu1 %v1622_v0 }
 0xb9f   :  { %1405 = vmatpush3.bf16.msra.mxu1 %v1730_v13 }
 0xba0   :  { %1412 = vmatprep.subr.bf16.mxu1 %v1622_v0 }
 0xc6d   :  { %v684_v45 = vpop.f32.mrb[4].mxu1 }
 0xc6e   :  { %v689_v46 = vrot.slane %v684_v45, 4  ;;  %v1313_v47 = vpop.f32.mrb[5].mxu1 }
 0xc70   :  { %v691_v48 = vadd.f32 %v689_v46, %v1753_v17 }
 0xc72   :  { %v1189_v49 = vmul.f32 -1.442695, %v691_v48 }
 0xc74   :  { %1462 = vpow2.f32 %v1189_v49 }
 0xc75   :  { %1464 = vtanh.f32 %v691_v48 }
 0xc7e   :  { %v1463_v50 = vpop.eup %1462 }
 0xc7f   :  { %v695_v51 = vadd.f32 1.0, %v1463_v50  ;;  %v1465_v52 = vpop.eup %1464 }
 0xc81   :  { %1466 = vrcp.f32 %v695_v51 }
 0xc8b   :  { %v1467_v53 = vpop.eup %1466 }
 0xc8c   :  { %v699_v54 = vsel %vm1756_vm4, %v1465_v52, %v1467_v53 }
 0xc8d   :  { %705 = vrot.lane.b32.xlu0 %v699_v54, %s1625_s3  ;;  %v703_v59 = vmul.f32 %v701_v57, %v699_v54 }
 0xcff   :  { %v706_v55 = vpop.permute.xlu0 %705 }
 0xd00   :  { %v708_v56 = vmul.f32 %v706_v55, %v699_v54 }
 0xd02   :  { %710 = vrot.lane.b32.xlu1 %v708_v56, %s1626_s8 }
 0xd74   :  { %v711_v60 = vpop.permute.xlu1 %710 }
 0xd75   :  { %v713_v61 = vadd.f32 %v711_v60, %v703_v59 }
 0xd77   :  { %1468 = vtanh.f32 %v713_v61  ;;  %v814_v18 = vrot.slane %v713_v61, 7 }
 0xd81   :  { %v1469_v62 = vpop.eup %1468 }
 0xd82   :  { %716 = vrot.lane.b32.xlu0 %v1469_v62, %s1625_s3 }
 0xdf4   :  { %v717_v63 = vpop.permute.xlu0 %716 }
 0xdf5   :  { %v1830_v2 = vmul.f32 %v717_v63, %v699_v54 }
 0xdf7   :  { %v726_v3 = vrot.slane %v1830_v2, 4 }
 0xdf9   :  { %727 = vrot.lane.b32.xlu1 %v726_v3, %s1626_s8 }
 0xe6b   :  { %v728_v4 = vpop.permute.xlu1 %727 }
 0xe6c   :  { %1323 = vmatmul.mubr.msk.f32.vlgmr.msra.gmra.mrb[6].mxu0 %vm89_vm1, %v728_v4 }
 0xe6d   :  { %1408 = vmatpush3.bf16.msra.mxu0 %v1726_v9  ;;  %1344 = vmatprep.mubr.msk.f32.mxu0 %vm1623_vm0, %v1624_v1 }
 0xe6e   :  { %1409 = vmatprep.subr.bf16.mxu0 %v1622_v0 }
 0xe71   :  { %1411 = vmatpush3.bf16.msra.mxu0 %v1730_v13 }
 0xf3f   :  { %v797_v5 = vpop.f32.mrb[6].mxu0 }
 0xf40   :  { %v802_v6 = vrot.slane %v797_v5, 3  ;;  %v1324_v7 = vpop.f32.mrb[7].mxu0 }
 0xf42   :  { %v804_v8 = vadd.f32 %v802_v6, %v1753_v17 }
 0xf44   :  { %v1191_v10 = vmul.f32 -1.442695, %v804_v8 }
 0xf46   :  { %1470 = vpow2.f32 %v1191_v10  ;;  %v1068_v10 = vld [vmem:[#allocation9 + $0x10] sm:$0xff] }
 0xf47   :  { %1472 = vtanh.f32 %v804_v8 }
 0xf50   :  { %v1471_v11 = vpop.eup %1470 }
 0xf51   :  { %v808_v12 = vadd.f32 1.0, %v1471_v11  ;;  %v1473_v14 = vpop.eup %1472  ;;  %v1069_v11 = vld [vmem:[#allocation9 + $0x18] sm:$0xff] }
 0xf53   :  { %1474 = vrcp.f32 %v808_v12  ;;  %v1416_v12 = vpack.c.bf16 %v1069_v11, %v1068_v10 }
 0xf5d   :  { %v1475_v9 = vpop.eup %1474 }
 0xf5e   :  { %v812_v15 = vsel %vm1756_vm4, %v1473_v14, %v1475_v9 }
 0xf5f   :  { %818 = vrot.lane.b32.xlu0 %v812_v15, %s1625_s3  ;;  %v816_v19 = vmul.f32 %v814_v18, %v812_v15 }
 0xfd1   :  { %v819_v16 = vpop.permute.xlu0 %818 }
 0xfd2   :  { %v821_v13 = vmul.f32 %v819_v16, %v812_v15 }
 0xfd4   :  { %823 = vrot.lane.b32.xlu1 %v821_v13, %s1626_s8 }
0x1046   :  { %v824_v21 = vpop.permute.xlu1 %823 }
0x1047   :  { %v826_v22 = vadd.f32 %v824_v21, %v816_v19 }
0x1049   :  { %1476 = vtanh.f32 %v826_v22  ;;  %v927_v40 = vrot.slane %v826_v22, 7 }
0x1053   :  { %v1477_v23 = vpop.eup %1476 }
0x1054   :  { %829 = vrot.lane.b32.xlu0 %v1477_v23, %s1625_s3 }
0x10c6   :  { %v830_v24 = vpop.permute.xlu0 %829 }
0x10c7   :  { %v832_v25 = vmul.f32 %v830_v24, %v812_v15 }
0x10c9   :  { %v839_v26 = vrot.slane %v832_v25, 5 }
0x10cb   :  { %840 = vrot.lane.b32.xlu1 %v839_v26, %s1626_s8 }
0x113d   :  { %v841_v28 = vpop.permute.xlu1 %840 }
0x113e   :  { %1334 = vmatmul.mubr.msk.f32.vlgmr.msra.gmra.mrb[6].mxu1 %vm89_vm1, %v841_v28 }
0x113f   :  { %1355 = vmatprep.mubr.msk.f32.mxu1 %vm1623_vm0, %v1624_v1 }
0x1211   :  { %v910_v29 = vpop.f32.mrb[6].mxu1 }
0x1212   :  { %v915_v30 = vrot.slane %v910_v29, 2  ;;  %v1335_v31 = vpop.f32.mrb[7].mxu1 }
0x1214   :  { %v917_v32 = vadd.f32 %v915_v30, %v1753_v17 }
0x1216   :  { %v1193_v33 = vmul.f32 -1.442695, %v917_v32 }
0x1218   :  { %1478 = vpow2.f32 %v1193_v33 }
0x1219   :  { %1480 = vtanh.f32 %v917_v32 }
0x1222   :  { %v1479_v34 = vpop.eup %1478 }
0x1223   :  { %v921_v35 = vadd.f32 1.0, %v1479_v34  ;;  %v1481_v36 = vpop.eup %1480 }
0x1225   :  { %1482 = vrcp.f32 %v921_v35 }
0x122f   :  { %v1483_v37 = vpop.eup %1482 }
0x1230   :  { %v925_v38 = vsel %vm1756_vm4, %v1481_v36, %v1483_v37 }
0x1231   :  { %931 = vrot.lane.b32.xlu0 %v925_v38, %s1625_s3  ;;  %v929_v41 = vmul.f32 %v927_v40, %v925_v38 }
0x12a3   :  { %v932_v39 = vpop.permute.xlu0 %931 }
0x12a4   :  { %v934_v1 = vmul.f32 %v932_v39, %v925_v38 }
0x12a6   :  { %936 = vrot.lane.b32.xlu1 %v934_v1, %s1626_s8 }
0x1318   :  { %v937_v43 = vpop.permute.xlu1 %936 }
0x1319   :  { %v939_v44 = vadd.f32 %v937_v43, %v929_v41 }
0x131b   :  { %1484 = vtanh.f32 %v939_v44 }
0x1325   :  { %v1485_v45 = vpop.eup %1484 }
0x1326   :  { %942 = vrot.lane.b32.xlu0 %v1485_v45, %s1625_s3 }
0x1398   :  { %v943_v46 = vpop.permute.xlu0 %942 }
0x1399   :  { %v945_v47 = vmul.f32 %v943_v46, %v925_v38 }
0x139b   :  { %v952_v48 = vrot.slane %v945_v47, 6 }
0x139d   :  { %953 = vrot.lane.b32.xlu1 %v952_v48, %s1626_s8 }
0x140f   :  { %v954_v49 = vpop.permute.xlu1 %953 }
0x1410   :  { %1345 = vmatmul.mubr.msk.f32.vlgmr.msra.gmra.mrb[8].mxu0 %vm89_vm1, %v954_v49 }
0x14e3   :  { %v1023_v50 = vpop.f32.mrb[8].mxu0 }
0x14e4   :  { %v1028_v51 = vrot.slane %v1023_v50, 1  ;;  %v1346_v52 = vpop.f32.mrb[9].mxu0 }
0x14e6   :  { %v1030_v53 = vadd.f32 %v1028_v51, %v1753_v17  ;;  %v1040_v17 = vrot.slane %v939_v44, 7 }
0x14e8   :  { %v1195_v54 = vmul.f32 -1.442695, %v1030_v53 }
0x14ea   :  { %1486 = vpow2.f32 %v1195_v54 }
0x14eb   :  { %1488 = vtanh.f32 %v1030_v53 }
0x14f4   :  { %v1487_v55 = vpop.eup %1486 }
0x14f5   :  { %v1034_v56 = vadd.f32 1.0, %v1487_v55  ;;  %v1489_v57 = vpop.eup %1488 }
0x14f7   :  { %1490 = vrcp.f32 %v1034_v56 }
0x1501   :  { %v1491_v59 = vpop.eup %1490 }
0x1502   :  { %v1038_v60 = vsel %vm1756_vm4, %v1489_v57, %v1491_v59 }
0x1503   :  { %1044 = vrot.lane.b32.xlu0 %v1038_v60, %s1625_s3  ;;  %v1042_v63 = vmul.f32 %v1040_v17, %v1038_v60 }
0x1575   :  { %v1045_v61 = vpop.permute.xlu0 %1044 }
0x1576   :  { %v1047_v62 = vmul.f32 %v1045_v61, %v1038_v60 }
0x1578   :  { %1049 = vrot.lane.b32.xlu1 %v1047_v62, %s1626_s8 }
0x157c   :  { %382 = vrot.lane.b32.xlu1 %v1779_v58, %s1626_s8  ;;  %v1066_v58 = vld [vmem:[#allocation9] sm:$0xff] }
0x1580   :  { %608 = vrot.lane.b32.xlu1 %v1813_v42, %s1626_s8  ;;  %v1067_v42 = vld [vmem:[#allocation9 + $0x8] sm:$0xff] }
0x1581   :  { %v1413_v8 = vpack.c.bf16 %v1067_v42, %v1066_v58 }
0x1583   :  { %1414 = vmatpush3.bf16.msra.mxu1 %v1413_v8 }
0x1584   :  { %834 = vrot.lane.b32.xlu1 %v832_v25, %s1626_s8  ;;  %1415 = vmatprep.subr.bf16.mxu1 %v1622_v0  ;;  %v1196_v0 = vld [vmem:[%s1897_s5] ss:$0 sm:$0xff]  ;;  %s1586_s5 = scalar_lea.vmem %s1169_s24, 128 }
0x1585   :  { %p1587_p4 = scmp.ne.s32.totalorder %s1169_s24, %s1586_s5  ;;  %p1592_p6 = scmp.lt.s32.totalorder %s1586_s5, %s1586_s5 }
0x1587   :  { %1417 = vmatpush3.bf16.msra.mxu1 %v1416_v12  ;;  %p1593_p7 = por %p1592_p6, %p1591_p5 }
0x1589   :  { %p1594_p8 = pnand %p1593_p7, %p1587_p4 }
0x15ea   :  { %v1050_v3 = vpop.permute.xlu1 %1049 }
0x15eb   :  { %v1052_v4 = vadd.f32 %v1050_v3, %v1042_v63 }
0x15ed   :  { %1492 = vtanh.f32 %v1052_v4 }
0x15ee   :  { %v383_v27 = vpop.permute.xlu1 %382 }
0x15ef   :  { %386 = vst.msk [vmem:[#allocation2] sm:$0x2] %vm385_vm6, %v383_v27 }
0x15f2   :  { %v609_v5 = vpop.permute.xlu1 %608 }
0x15f3   :  { %612 = vst.msk [vmem:[#allocation2] sm:$0x8] %vm611_vm7, %v609_v5 }
0x15f6   :  { %v835_v6 = vpop.permute.xlu1 %834 }
0x15f7   :  { %v1493_v7 = vpop.eup %1492  ;;  %838 = vst.msk [vmem:[#allocation2] sm:$0x20] %vm837_vm8, %v835_v6 }
0x15f8   :  { %1055 = vrot.lane.b32.xlu0 %v1493_v7, %s1625_s3 }
0x15fc   :  { %495 = vrot.lane.b32.xlu0 %v1796_v20, %s1626_s8 }
0x1600   :  { %721 = vrot.lane.b32.xlu0 %v1830_v2, %s1626_s8 }
0x1604   :  { %947 = vrot.lane.b32.xlu0 %v945_v47, %s1626_s8 }
0x166a   :  { %v1056_v14 = vpop.permute.xlu0 %1055 }
0x166b   :  { %v1058_v9 = vmul.f32 %v1056_v14, %v1038_v60 }
0x166d   :  { %1060 = vrot.lane.b32.xlu1 %v1058_v9, %s1626_s8 }
0x166e   :  { %v496_v20 = vpop.permute.xlu0 %495 }
0x166f   :  { %499 = vst.msk [vmem:[#allocation2] sm:$0x4] %vm498_vm9, %v496_v20 }
0x1672   :  { %v722_v2 = vpop.permute.xlu0 %721 }
0x1673   :  { %725 = vst.msk [vmem:[#allocation2] sm:$0x10] %vm724_vm10, %v722_v2 }
0x1676   :  { %v948_v15 = vpop.permute.xlu0 %947 }
0x1677   :  { %951 = vst.msk [vmem:[#allocation2] sm:$0x40] %vm950_vm11, %v948_v15 }
0x16df   :  { %v1061_v16 = vpop.permute.xlu1 %1060 }
0x16e0   :  { %1064 = vst.msk [vmem:[#allocation2] sm:$0x80] %vm1063_vm12, %v1061_v16 }
0x16e7   :  { %v1065_v13 = vld [vmem:[#allocation2] sm:$0xff] }
0x16e8   :  { %1356 = vmatmul.mubr.msk.f32.vlgmr.msra.gmra.mrb[8].mxu1 %vm89_vm1, %v1065_v13 }
0x17bb   :  { %v1146_v18 = vpop.f32.mrb[8].mxu1 }
0x17bc   :  { %v1147_v19 = vadd.f32 %v1196_v0, %v1146_v18  ;;  %v1357_v21 = vpop.f32.mrb[9].mxu1 }
0x17be   :  { %1150 = vmax.xlane.f32.xlu0 %v1147_v19 }
0x184b   :  { %v1151_v22 = vpop.xlane.xlu0 %1150 }
0x184c   :  { %v1152_v23 = vsub.f32 %v1147_v19, %v1151_v22 }
0x184e   :  { %v1153_v24 = vmul.f32 1.442695, %v1152_v23 }
0x1850   :  { %1494 = vpow2.f32 %v1153_v24 }
0x185a   :  { %v1495_v25 = vpop.eup %1494 }
0x185b   :  { %1155 = vadd.xlane.f32.xlu1 %v1495_v25 }
0x18e8   :  { %v1156_v26 = vpop.xlane.xlu1 %1155 }
0x18e9   :  { %1496 = vlog2.f32 %v1156_v26 }
0x18f3   :  { %v1497_v28 = vpop.eup %1496 }
0x18f4   :  { %v1158_v29 = vmul.f32 0.6931472, %v1497_v28 }
0x18f6   :  { %v1159_v30 = vadd.f32 %v1158_v29, %v1151_v22 }
0x18f8   :  { %v1160_v31 = vsub.f32 %v1147_v19, %v1159_v30 }
0x18fa   :  { %1161 = vst [vmem:[#allocation11] sm:$0xff] %v1160_v31 }
0x18fb   :  { %1597 = shalt.err (!%p1594_p8)
}
0x18fc   :  { %s1598_s27 = scalar_lea.hbm %s1898_s6, 128 }
0x18fd   :  { %p1599_p9 = scmp.ne.s32.totalorder %s1898_s6, %s1598_s27  ;;  %p1602_p10 = scmp.lt.u32.totalorder %s1598_s27, %s1898_s6 }
0x18ff   :  { %p1604_p11 = pnand %p1602_p10, %p1599_p9 }
0x1901   :  { %1607 = shalt.err (!%p1604_p11)
}
0x1902   :  { %1171 = dma.vmem_to_hbm [thread:$0]  %s1169_s24, 128, %s1898_s6, [#allocation5]  }
0x1903   :  { %1614 = dma.done.wait [#allocation5], 128  }
0x1904   :  { %1615 = vsyncadd [#allocation5], 4294967168 }
0x1905   :  { %1175 = vsyncpa [#allocation4], 1 }
0x1906   :  { %1176 = vsyncpa [#allocation7], 1 }
0x1907   :  { %1177 = vsyncpa [#allocation10], 1 }
0x1908   :  { %1178 = vsyncpa [#allocation5], 1 }

</bundles_post_ra>
